<compile_context>
chip_gen: v7x
topology: tpu7x:2x2x1
jax: 0.10.0
libtpu: 0.0.40
codegen_flags: <defaults>
</compile_context>

<pallas_src>
import jax
import jax.numpy as jnp
from jax import lax
from jax.experimental import pallas as pl
from jax.experimental.pallas import tpu as pltpu


def _round_up(x, m):
    return (x + m - 1) // m * m


def _vmem_caps():
    """Return (tile-sizing budget, scoped-VMEM limit) in bytes, generation-aware."""
    try:
        cap = pltpu.get_tpu_info().vmem_capacity_bytes
    except Exception:
        cap = 64 << 20                      # conservative fallback: v7x per-TC VMEM
    budget = min(int(cap * 0.6), 48 << 20)  # what the tile picker may plan for
    limit = int(min(cap * 7 // 8, 56 << 20))
    return budget, limit


def _pick_lc_tile(lc, lq, d, itemsize, budget_bytes):
    """Largest Lc tile that fits the VMEM budget (large / 256-multiples first)."""
    sub = 8 if itemsize >= 4 else 16        # minimum sublane tile per dtype
    lc_ceil = _round_up(lc, sub)
    cands = [t for t in (1024, 512, 256, 128, 64, 32, 16, 8)
             if t % sub == 0 and t <= lc_ceil]
    if not cands:
        cands = [lc_ceil]
    for tlc in cands:
        need = (2 * tlc * d * itemsize          # context in (double-buffered)
                + 2 * tlc * 2 * d * itemsize    # fused [ctx|attn] out (double-buffered)
                + 2 * lq * d * itemsize         # resident question (double-buffered)
                + 3 * 4 * tlc * lq              # live f32 (TLc, Lq) temps: e, p, cast
                + 2 * 4 * tlc * d)              # f32 accumulator + normalized temp
        if need <= budget_bytes:
            return tlc
    return cands[-1]


def _basic_attention_kernel(q_ref, c_ref, o_ref):
    # q_ref: (1, Lq,  D)    resident across the Lc-tile axis
    # c_ref: (1, TLc, D)    one Lc tile of context
    # o_ref: (1, TLc, 2*D)  fused [context | attention_output] tile
    hp = lax.Precision.HIGHEST
    q = q_ref[0]                                            # (Lq,  D)
    c = c_ref[0]                                            # (TLc, D)

    # e = context @ question^T : contract on D directly (no XLU transpose of q).
    e = lax.dot_general(c, q,
                        dimension_numbers=(((1,), (1,)), ((), ())),
                        precision=hp,
                        preferred_element_type=jnp.float32)  # (TLc, Lq) f32

    # Numerically stable softmax over Lq (f32).  Normalization is deferred to
    # after the second matmul (it is linear in the per-row scale), so only
    # (TLc, D) elements get scaled instead of (TLc, Lq).
    m = jnp.max(e, axis=-1, keepdims=True)
    p = jnp.exp(e - m)
    denom = jnp.sum(p, axis=-1, keepdims=True)               # (TLc, 1)

    acc = lax.dot_general(p.astype(q.dtype), q,
                          dimension_numbers=(((1,), (0,)), ((), ())),
                          precision=hp,
                          preferred_element_type=jnp.float32)  # (TLc, D) f32
    attn_out = acc / denom                                     # exact normalize

    # Fused concat: single full-block store of [context | attention_output],
    # reusing the context tile already resident in VMEM.
    o_ref[0] = jnp.concatenate(
        [c.astype(o_ref.dtype), attn_out.astype(o_ref.dtype)], axis=-1)


def basic_attention(question, context, dropout_p=0.0):
    """Pallas-TPU forward of BasicAttention (eval-mode dropout)."""
    assert dropout_p == 0.0, "only eval / p=0 dropout supported"
    B, Lq, D = question.shape
    B2, Lc, D2 = context.shape
    assert B == B2 and D == D2

    itemsize = jnp.dtype(question.dtype).itemsize
    budget, vmem_limit = _vmem_caps()
    tlc = _pick_lc_tile(Lc, Lq, D, itemsize, budget)
    lc_pad = _round_up(Lc, tlc)

    c_in = context
    if lc_pad != Lc:
        # Only the tiled Lc axis ever needs padding; padded (zero) context rows
        # produce finite, ignored values that are sliced off below.
        c_in = jnp.pad(context, ((0, 0), (0, lc_pad - Lc), (0, 0)))

    out = pl.pallas_call(
        _basic_attention_kernel,
        out_shape=jax.ShapeDtypeStruct((B, lc_pad, 2 * D), question.dtype),
        grid_spec=pltpu.PrefetchScalarGridSpec(
            num_scalar_prefetch=0,
            grid=(B, lc_pad // tlc),
            in_specs=[
                # question: same block for every Lc tile -> stays resident.
                # Full-extent (Lq, D) block dims waive the (8,128) rule, so no
                # wrapper padding pass is needed.
                pl.BlockSpec((1, Lq, D), lambda b, i: (b, 0, 0)),
                # context: one (TLc, D) slab per grid step.
                pl.BlockSpec((1, tlc, D), lambda b, i: (b, i, 0)),
            ],
            out_specs=pl.BlockSpec((1, tlc, 2 * D), lambda b, i: (b, i, 0)),
        ),
        compiler_params=pltpu.CompilerParams(
            dimension_semantics=("parallel", "parallel"),
            vmem_limit_bytes=vmem_limit),
    )(question, c_in)

    if lc_pad != Lc:
        out = out[:, :Lc, :]
    return out


def _reference(question, context):
    hp = lax.Precision.HIGHEST
    e = jnp.einsum("bcd,bqd->bcq", context, question, precision=hp)
    attn = jax.nn.softmax(e, axis=-1)
    attn_out = jnp.einsum("bcq,bqd->bcd", attn, question, precision=hp)
    return jnp.concatenate([context, attn_out], axis=-1)


if __name__ == "__main__":
    key = jax.random.PRNGKey(0)
    kq, kc = jax.random.split(key)

    B, Lq, Lc, D = 2, 8, 16, 32
    question = jax.random.normal(kq, (B, Lq, D), dtype=jnp.float32)
    context = jax.random.normal(kc, (B, Lc, D), dtype=jnp.float32)

    out = basic_attention(question, context, dropout_p=0.0)
    out = jax.block_until_ready(out)

    ref = _reference(question, context)
    assert out.shape == (B, Lc, 2 * D)
    assert jnp.allclose(out, ref, atol=2e-3, rtol=2e-3), \
        float(jnp.max(jnp.abs(out - ref)))

    print("KERNEL_OK")
</pallas_src>

<mosaic_0001>
module attributes {stable_mosaic.version = 11 : i64} {
  func.func @_basic_attention_kernel(%arg0: i32, %arg1: i32, %arg2: memref<1x8x32xf32, #tpu.memory_space<vmem>>, %arg3: memref<1x16x32xf32, #tpu.memory_space<vmem>>, %arg4: memref<1x16x64xf32, #tpu.memory_space<vmem>>) attributes {dimension_semantics = [#tpu.dimension_semantics<parallel>, #tpu.dimension_semantics<parallel>], iteration_bounds = array<i64: 2, 1>, scalar_prefetch = 0 : i64, scratch_operands = 0 : i64, tpu.core_type = #tpu.core_type<tc>, window_params = [{transform_indices = @transform_0, window_bounds = array<i64: 1, 8, 32>}, {transform_indices = @transform_1, window_bounds = array<i64: 1, 16, 32>}, {transform_indices = @transform_2, window_bounds = array<i64: 1, 16, 64>}]} {
    %c0 = arith.constant 0 : index
    %c0_0 = arith.constant 0 : index
    %c0_1 = arith.constant 0 : index
    %0 = vector.load %arg2[%c0, %c0_0, %c0_1] : memref<1x8x32xf32, #tpu.memory_space<vmem>>, vector<1x8x32xf32>
    %1 = vector.shape_cast %0 : vector<1x8x32xf32> to vector<8x32xf32>
    %c0_2 = arith.constant 0 : index
    %c0_3 = arith.constant 0 : index
    %c0_4 = arith.constant 0 : index
    %2 = vector.load %arg3[%c0_2, %c0_3, %c0_4] : memref<1x16x32xf32, #tpu.memory_space<vmem>>, vector<1x16x32xf32>
    %3 = vector.shape_cast %2 : vector<1x16x32xf32> to vector<16x32xf32>
    %cst = arith.constant dense<0.000000e+00> : vector<16x8xf32>
    %4 = tpu.matmul %3, %1, %cst {dimension_numbers = #tpu.dot_dimension_numbers<[1], [1], [0], [0], [0, 0, 1, 0], [], []>, precision = #tpu.contract_precision<fp32>} : vector<16x32xf32>, vector<8x32xf32>, vector<16x8xf32> -> vector<16x8xf32>
    %cst_5 = arith.constant dense<0xFF800000> : vector<16xf32>
    %5 = vector.multi_reduction <maximumf>, %4, %cst_5 [1] : vector<16x8xf32> to vector<16xf32>
    %6 = vector.shape_cast %5 : vector<16xf32> to vector<16x1xf32>
    %7 = vector.broadcast %6 : vector<16x1xf32> to vector<16x8xf32>
    %8 = arith.subf %4, %7 : vector<16x8xf32>
    %9 = math.exp %8 : vector<16x8xf32>
    %cst_6 = arith.constant dense<0.000000e+00> : vector<16xf32>
    %10 = vector.multi_reduction <add>, %9, %cst_6 [1] : vector<16x8xf32> to vector<16xf32>
    %11 = vector.shape_cast %10 : vector<16xf32> to vector<16x1xf32>
    %cst_7 = arith.constant dense<0.000000e+00> : vector<16x32xf32>
    %12 = tpu.matmul %9, %1, %cst_7 {dimension_numbers = #tpu.dot_dimension_numbers<[1], [0], [0], [1], [0, 0, 1, 1], [], []>, precision = #tpu.contract_precision<fp32>} : vector<16x8xf32>, vector<8x32xf32>, vector<16x32xf32> -> vector<16x32xf32>
    %13 = vector.broadcast %11 : vector<16x1xf32> to vector<16x32xf32>
    %14 = arith.divf %12, %13 : vector<16x32xf32>
    %15 = tpu.concatenate %3, %14 in 1 : vector<16x32xf32>, vector<16x32xf32> -> vector<16x64xf32>
    %c0_8 = arith.constant 0 : index
    %c0_9 = arith.constant 0 : index
    %c0_10 = arith.constant 0 : index
    %16 = vector.load %arg4[%c0_8, %c0_9, %c0_10] : memref<1x16x64xf32, #tpu.memory_space<vmem>>, vector<1x16x64xf32>
    %17 = vector.shape_cast %16 : vector<1x16x64xf32> to vector<16x64xf32>
    %18 = vector.shape_cast %15 : vector<16x64xf32> to vector<1x16x64xf32>
    tpu.vector_store %arg4[%c0_8, %c0_9, %c0_10], %18 {strides = array<i32>} : memref<1x16x64xf32, #tpu.memory_space<vmem>>, vector<1x16x64xf32>,
    return
  }
  func.func @transform_0(%arg0: i32, %arg1: i32) -> (i32, i32, i32) {
    %c0_i32 = arith.constant 0 : i32
    %c0_i32_0 = arith.constant 0 : i32
    %c0_i32_1 = arith.constant 0 : i32
    return %arg0, %c0_i32, %c0_i32_0 : i32, i32, i32
  }
  func.func @transform_1(%arg0: i32, %arg1: i32) -> (i32, i32, i32) {
    %c0_i32 = arith.constant 0 : i32
    %c0_i32_0 = arith.constant 0 : i32
    return %arg0, %arg1, %c0_i32 : i32, i32, i32
  }
  func.func @transform_2(%arg0: i32, %arg1: i32) -> (i32, i32, i32) {
    %c0_i32 = arith.constant 0 : i32
    %c0_i32_0 = arith.constant 0 : i32
    return %arg0, %arg1, %c0_i32 : i32, i32, i32
  }
}

</mosaic_0001>

<bundles_post_ra>
// kernel: tpu_custom_call.1
= control target key start
LH: loop header
LB: loop body
LE: loop exit
PB: predicated region body
PF: predicated region fallthrough
CT: control target
= control target key end

     0   :  { %7 = vsyncpa [#allocation3], 0  ;;  %s2013_s0 = inlined_call_operand.hbm [shape: f32[2,8,32], index: 0, kind: input, shape index: {}]   ;;  %s2014_s1 = inlined_call_operand.hbm [shape: f32[2,16,32], index: 1, kind: input, shape index: {}]   ;;  %s2015_s2 = inlined_call_operand.hbm [shape: f32[2,16,64], index: 2, kind: output, shape index: {}]  }
   0x1   :  { %9 = vsyncpa [#allocation3 + $0x1], 0 }
   0x2   :  { %10 = vsyncpa [#allocation6], 0 }
   0x3   :  { %12 = vsyncpa [#allocation6 + $0x1], 0 }
   0x4   :  { %13 = vsyncpa [#allocation4], 0 }
   0x5   :  { %15 = vsyncpa [#allocation4 + $0x1], 0  ;;  %s1765_s9 = smov 0   ;;  %s1767_s10 = smov 0  }
   0x6   :  { %s1769_s11 = smov 0   ;;  %s1771_s12 = smov 0  }
   0x7   :  { %s1773_s13 = smov 0   ;;  %s1775_s14 = smov 0  }
   0x8 LB: > { %s1378_s15 = sadd.s32 4294967295, %s1740_s14   ;;  %s1379_s16 = sadd.s32 4294967294, %s1740_s14   ;;  %s1740_s14 = sphi %s1775_s14, %s21_s14   ;;  %s1736_s13 = sphi %s1773_s13, %s2034_s13   ;;  %s1732_s12 = sphi %s1771_s12, %s2033_s12   ;;  %s1728_s11 = sphi %s1769_s11, %s2032_s11   ;;  %s1724_s10 = sphi %s1767_s10, %s2031_s10   ;;  %s1720_s9 = sphi %s1765_s9, %s2030_s9  }
   0x9   : > { %s33_s17 = sadd.s32 1, %s1736_s13  ;;  %s40_s18 = sadd.s32 1, %s1728_s11 }
   0xa   : > { %p35_p0 = scmp.ge.s32.totalorder %s33_s17, 2  ;;  %p47_p1 = scmp.ne.s32.totalorder %s1728_s11, %s1724_s10 }
   0xb   : > { %p48_p2 = scmp.eq.s32.totalorder %s1740_s14, 0  ;;  %p53_p3 = scmp.ne.s32.totalorder %s1724_s10, %s1720_s9 }
   0xc   : > { %s2036_s17 = smov (%p35_p0, %s33_s17), 0  ;;  %p54_p5 = scmp.eq.s32.totalorder %s1378_s15, 0 }
   0xd   : > { %p1806_p4 = por %p48_p2, %p47_p1  ;;  %s37_s20 = ssub.s32 %s1736_s13, %s2036_s17 }
   0xe   : > { %p107_p6 = scmp.eq.s32.totalorder %s1378_s15, 1  ;;  %p38_p7 = scmp.eq.s32.totalorder %s37_s20, 0 }
   0xf   : > { %p1812_p8 = por %p54_p5, %p53_p3  ;;  %p113_p10 = scmp.eq.s32.totalorder %s1379_s16, 1 }
  0x10   : > { %p1816_p9 = por %p107_p6, %p47_p1  ;;  %p1531_p13 = scmp.lt.s32.totalorder %s1740_s14, 2 }
  0x11   : > { %s2019_s21 = scalar_select %p1812_p8, 1, 0 }
  0x12   : > { %s2020_s22 = scalar_select %p1816_p9, 1, 0 }
  0x13   : > { %s1821_s23 = scalar_select %p38_p7, %s1728_s11, %s40_s18  }
  0x14   : > { %p1823_p11 = por %p113_p10, %p53_p3  ;;  %s1830_s25 = sand.u32 1, %s1728_s11  }
  0x15   : > { %s1382_s26 = sshll.u32 %s1830_s25, 3  ;;  %s1383_s27 = sshll.u32 %s1736_s13, 7 }
  0x16   : > { %s2021_s24 = scalar_select %p1823_p11, 1, 0 }
  0x17   : > { %s1837_s30 = scalar_lea.hbm %s2013_s0, %s1383_s27  ;;  %s137_s3 = scalar_lea.vmem [#allocation2], %s1382_s26 }
  0x18   : > { %s144_s4 = sshll.u32 %s137_s3, 4  ;;  %p1843_p0 = pnand %p1531_p13, %p1806_p4  ;;  %s1839_s4 = int_to_ptr.vmem [resolvable:$true] %s144_s4 }
  0x19   : > { %s134_s6 = scalar_lea.sflag [#allocation3], %s1830_s25  ;;  %s1594_s7 = scalar_lea.hbm %s1837_s30, 128 }
  0x1a   : > { %p1595_p3 = scmp.ne.s32.totalorder %s1837_s30, %s1594_s7  ;;  %p1596_p5 = pneg %p1843_p0 }
  0x1b   : > { %s1599_s16 = scalar_lea.hbm %s2013_s0, 256  ;;  %p1600_p4 = scmp.lt.u32.totalorder %s1837_s30, %s2013_s0 }
  0x1c   : > { %p1597_p6 = pnand %p1596_p5, %p1595_p3  ;;  %p1601_p10 = scmp.lt.u32.totalorder %s1599_s16, %s1594_s7 }
  0x1d   : > { %p1603_p12 = scmp.lt.u32.totalorder %s1594_s7, %s1837_s30 }
  0x1e   : > { %p1598_p7 = pneg %p1597_p6  ;;  %p1602_p13 = por %p1601_p10, %p1600_p4 }
  0x20   : > { %p1604_p1 = por %p1603_p12, %p1602_p13 }
  0x22   : > { %p1605_p2 = pnand %p1604_p1, %p1598_p7 }
  0x24   : > { %1608 = shalt.err (!%p1605_p2)
}
  0x25   : > { %s1609_s20 = scalar_lea.vmem %s1839_s4, 128  ;;  %s1742_s26 = smov [#allocation2]  }
  0x26   : > { %p1610_p3 = scmp.ne.s32.totalorder %s1839_s4, %s1609_s20  ;;  %s1614_s27 = sshll.u32 %s1742_s26, 4  ;;  %s1615_s27 = int_to_ptr.vmem [resolvable:$false] %s1614_s27 }
  0x27   : > { %s1616_s28 = scalar_lea.vmem %s1615_s27, 256  ;;  %p1617_p9 = scmp.lt.s32.totalorder %s1839_s4, %s1615_s27 }
  0x28   : > { %p1612_p6 = pnand %p1610_p3, %p1596_p5  ;;  %p1618_p4 = scmp.lt.s32.totalorder %s1616_s28, %s1609_s20 }
  0x2a   : > { %p1613_p11 = pneg %p1612_p6  ;;  %p1619_p10 = por %p1618_p4, %p1617_p9 }
  0x2c   : > { %p1620_p12 = pnand %p1619_p10, %p1613_p11 }
  0x2e   : > { %1623 = shalt.err (!%p1620_p12)
}
  0x2f   : > { %1523 = dma.hbm_to_vmem [thread:$0]  (!%p1843_p0), %s1837_s30, 128, %s1839_s4, %s134_s6  }
  0x30   : > { %p2023_p1 = scmp.lt.s32.totalorder %s1740_s14, 3  ;;  %p2024_p2 = scmp.ge.s32.totalorder %s1740_s14, 1 }
  0x31   : > { %s1384_s3 = sshll.u32 %s1830_s25, 4  ;;  %s1396_s7 = sshll.u32 %s1736_s13, 8 }
  0x32   : > { %p1879_p7 = pnand %p2024_p2, %p2023_p1  ;;  %s1888_s16 = scalar_lea.hbm %s2014_s1, %s1396_s7 }
  0x33   : > { %s155_s18 = scalar_lea.vmem [#allocation5], %s1384_s3  ;;  %s152_s30 = scalar_lea.sflag [#allocation6], %s1830_s25 }
  0x34   : > { %s164_s19 = sshll.u32 %s155_s18, 4  ;;  %s1624_s4 = scalar_lea.hbm %s1888_s16, 256  ;;  %s1890_s19 = int_to_ptr.vmem [resolvable:$true] %s164_s19 }
  0x35   : > { %p1625_p9 = scmp.ne.s32.totalorder %s1888_s16, %s1624_s4  ;;  %s1629_s26 = scalar_lea.hbm %s2014_s1, 512 }
  0x36   : > { %p1630_p3 = scmp.lt.u32.totalorder %s1888_s16, %s2014_s1  ;;  %p1631_p6 = scmp.lt.u32.totalorder %s1629_s26, %s1624_s4 }
  0x37   : > { %p1627_p11 = pnand %p1625_p9, %p1596_p5  ;;  %p1633_p10 = scmp.lt.u32.totalorder %s1624_s4, %s1888_s16 }
  0x38   : > { %p1632_p4 = por %p1631_p6, %p1630_p3 }
  0x39   : > { %p1628_p13 = pneg %p1627_p11 }
  0x3a   : > { %p1634_p12 = por %p1633_p10, %p1632_p4 }
  0x3c   : > { %p1635_p1 = pnand %p1634_p12, %p1628_p13 }
  0x3e   : > { %1638 = shalt.err (!%p1635_p1)
}
  0x3f   : > { %s1639_s3 = scalar_lea.vmem %s1890_s19, 256  ;;  %s1743_s7 = smov [#allocation5]  }
  0x40   : > { %p1640_p2 = scmp.ne.s32.totalorder %s1890_s19, %s1639_s3  ;;  %s1644_s8 = sshll.u32 %s1743_s7, 4  ;;  %s1645_s8 = int_to_ptr.vmem [resolvable:$false] %s1644_s8 }
  0x41   : > { %s1646_s15 = scalar_lea.vmem %s1645_s8, 512  ;;  %p1647_p8 = scmp.lt.s32.totalorder %s1890_s19, %s1645_s8 }
  0x42   : > { %p1642_p9 = pnand %p1640_p2, %p1596_p5  ;;  %p1648_p3 = scmp.lt.s32.totalorder %s1646_s15, %s1639_s3 }
  0x44   : > { %p1643_p11 = pneg %p1642_p9  ;;  %p1649_p6 = por %p1648_p3, %p1647_p8 }
  0x46   : > { %p1650_p4 = pnand %p1649_p6, %p1643_p11 }
  0x48   : > { %1653 = shalt.err (!%p1650_p4)
}
  0x49   : > { %s1744_s18 = smov 128   ;;  %s1745_s4 = smov 8  }
  0x4a   : > { %1526 = dma.hbm_to_vmem [thread:$0]  (!%p1843_p0), %s1888_s16, 256, %s1890_s19, %s152_s30, %s1744_s18, %s1744_s18, %s1745_s4  }
  0x4b   : > { %176 = sbr.rel (%p1879_p7) target bundleno = 911 (0x38f), region = 28  ;;  %s1921_s6 = sand.u32 (!%p1879_p7), 1, %s1724_s10  }
  0x4c   : > { %s1388_s20 = sshll.u32 (!%p1879_p7), %s1921_s6, 3  ;;  %s179_s26 = scalar_lea.sflag (!%p1879_p7), [#allocation3], %s1921_s6 }
  0x4d   : > { %s182_s27 = scalar_lea.vmem (!%p1879_p7), [#allocation2], %s1388_s20  ;;  %p2026_p8 = scmp.ne.s32.totalorder (!%p1879_p7), %s2019_s21, 0 }
  0x52   : > { %1707 = dma.done.wait (%p2026_p8), %s179_s26, 128  }
  0x53   : > { %1709 = vsyncadd (%p2026_p8), %s179_s26, 4294967168  ;;  %s1389_s25 = sshll.u32 %s1921_s6, 4  ;;  %s188_s5 = scalar_lea.sflag [#allocation6], %s1921_s6 }
  0x54   : > { %s191_s29 = scalar_lea.vmem [#allocation5], %s1389_s25 }
  0x55   : > { %1711 = dma.done.wait (%p2026_p8), %s188_s5, 256  }
  0x56   : > { %1713 = vsyncadd (%p2026_p8), %s188_s5, 4294967040  ;;  %vm222_vm0 = vcmask 261120   ;;  %v219_v0 = vld [vmem:[%s182_s27] sm:$0xff]  ;;  %v1937_v1 = vld [vmem:[%s191_s29] sm:$0xff]  ;;  %vm721_vm1 = vcmask 64512   ;;  %s1746_s21 = smov 32  }
  0x57   : > { %v1939_v2 = vld [vmem:[%s191_s29 + $0x8] sm:$0xff]  ;;  %v230_v3 = vsel %vm222_vm0, %v219_v0, 0  ;;  %v224_v4 = vsel %vm222_vm0, %v1937_v1, 0  ;;  %v747_v25 = vand.u32 4294901760, %v219_v0  ;;  %s216_s16 = scalar_lea.vmem [#allocation7], %s1389_s25  ;;  %s1397_s30 = sshll.u32 %s1732_s12, 8 }
  0x58   : > { %v227_v5 = vsel %vm222_vm0, %v1939_v2, 0  ;;  %v233_v6 = vand.u32 4294901760, %v230_v3  ;;  %v298_v7 = vand.u32 4294901760, %v224_v4  ;;  %s1268_s19 = sshll.u32 %s216_s16, 4  ;;  %vm1249_vm2 = vcmask 523264   ;;  %s1960_s7 = scalar_lea.hbm %s2015_s2, %s1397_s30  ;;  %s1955_s19 = int_to_ptr.vmem [resolvable:$true] %s1268_s19 }
  0x59   : > { %v308_v8 = vand.u32 4294901760, %v227_v5  ;;  %1464 = vmatprep.subr.mxu1 %v747_v25  ;;  %v834_v26 = vsub.f32 %v219_v0, %v747_v25  ;;  %s1253_s12 = scalar_lea.sflag [#allocation4], %s1921_s6  ;;  %s1654_s8 = scalar_lea.vmem %s1955_s19, 256 }
  0x5a   : > { %1434 = vmatprep.subr.mxu0 %v233_v6  ;;  %v299_v9 = vsub.f32 %v224_v4, %v298_v7  ;;  %v320_v10 = vsub.f32 %v230_v3, %v233_v6  ;;  %1465 = vmatpush3.msra.mxu1 %v747_v25  ;;  %p1655_p0 = scmp.ne.s32.totalorder %s1955_s19, %s1654_s8  ;;  %p2027_p5 = scmp.ne.s32.totalorder %s2020_s22, 0 }
  0x5b   : > { %v309_v11 = vsub.f32 %v227_v5, %v308_v8  ;;  %1435 = vmatpush3.xpose.msra.mxu0 %v233_v6  ;;  %v835_v27 = vand.u32 4294901760, %v834_v26  ;;  %s1747_s15 = smov [#allocation7]  }
  0x5c   : > { %v300_v12 = vand.u32 4294901760, %v299_v9  ;;  %v321_v13 = vand.u32 4294901760, %v320_v10  ;;  %p1656_p7 = pnand %p1655_p0, %p2027_p5  ;;  %s1658_s18 = sshll.u32 %s1747_s15, 4  ;;  %s1659_s18 = int_to_ptr.vmem [resolvable:$false] %s1658_s18 }
  0x5d   : > { %v310_v14 = vand.u32 4294901760, %v309_v11  ;;  %v836_v28 = vsub.f32 %v834_v26, %v835_v27  ;;  %s1660_s4 = scalar_lea.vmem %s1659_s18, 512  ;;  %p1661_p10 = scmp.lt.s32.totalorder %s1955_s19, %s1659_s18 }
  0x5e   : > { %v301_v15 = vsub.f32 %v299_v9, %v300_v12  ;;  %v322_v16 = vsub.f32 %v320_v10, %v321_v13  ;;  %p1657_p13 = pneg %p1656_p7  ;;  %p1662_p12 = scmp.lt.s32.totalorder %s1660_s4, %s1654_s8 }
  0x5f   : > { %v311_v17 = vsub.f32 %v309_v11, %v310_v14  ;;  %v837_v29 = vand.u32 4294901760, %v836_v28 }
  0x60   : > { %v302_v18 = vand.u32 4294901760, %v301_v15  ;;  %v323_v19 = vand.u32 4294901760, %v322_v16  ;;  %p1663_p1 = por %p1662_p12, %p1661_p10 }
  0x61   : > { %v312_v20 = vand.u32 4294901760, %v311_v17  ;;  %1469 = vmatprep.subr.mxu1 %v837_v29 }
  0x62   : > { %1436 = vmatprep.mubr.f32.mxu0 %v302_v18  ;;  %1439 = vmatprep.subr.mxu0 %v323_v19  ;;  %p1664_p2 = pnand %p1663_p1, %p1657_p13 }
  0x63   : > { %1437 = vmatmul.mubr.f32.vlgmr.msra.gmra.mrb[0].mxu0 %v312_v20 }
  0x64   : > { %1440 = vmatpush3.xpose.msra.mxu0 %v323_v19  ;;  %1441 = vmatprep.mubr.f32.mxu0 %v298_v7 }
  0x65   : > { %1444 = vmatprep.subr.mxu0 %v320_v10 }
  0x6b   : > { %1442 = vmatmul.mubr.f32.vlgmr.msra.gmra.mrb[0].mxu0 %v308_v8 }
  0x6c   : > { %1445 = vmatpush3.xpose.msra.mxu0 %v320_v10  ;;  %1446 = vmatprep.mubr.f32.mxu0 %v299_v9 }
  0x6d   : > { %1449 = vmatprep.subr.mxu0 %v233_v6 }
  0x73   : > { %1447 = vmatmul.mubr.f32.vlgmr.msra.gmra.mrb[0].mxu0 %v309_v11 }
  0x74   : > { %1450 = vmatpush3.xpose.msra.mxu0 %v233_v6  ;;  %1451 = vmatprep.mubr.f32.mxu0 %v300_v12 }
  0x75   : > { %1454 = vmatprep.subr.mxu0 %v321_v13 }
  0x7b   : > { %1452 = vmatmul.mubr.f32.vlgmr.msra.gmra.mrb[0].mxu0 %v310_v14 }
  0x7c   : > { %1455 = vmatpush3.xpose.msra.mxu0 %v321_v13  ;;  %1456 = vmatprep.mubr.f32.mxu0 %v298_v7 }
  0x7d   : > { %1459 = vmatprep.subr.mxu0 %v233_v6 }
  0x83   : > { %1457 = vmatmul.mubr.f32.vlgmr.msra.gmra.mrb[0].mxu0 %v308_v8 }
  0x84   : > { %1460 = vmatpush3.xpose.msra.mxu0 %v233_v6  ;;  %1461 = vmatprep.mubr.f32.mxu0 %v298_v7 }
  0x8b   : > { %1462 = vmatmul.mubr.f32.vlgmr.msra.gmra.mrb[0].mxu0 %v308_v8 }
 0x15e   : > { %v1463_v21 = vpop.f32.mrb[0].mxu0 }
 0x15f   : > { %v711_v22 = vpop.f32.mrb[1].mxu0  ;;  %v725_v24 = vsel %vm721_vm1, %v1463_v21, -inf }
 0x160   : > { %v722_v23 = vsel %vm721_vm1, %v711_v22, -inf }
 0x161   : > { %723 = vmax.xlane.f32.xlu0 %v722_v23 }
 0x165   : > { %726 = vmax.xlane.f32.xlu0 %v725_v24 }
 0x1ee   : > { %v724_v30 = vpop.xlane.xlu0 %723 }
 0x1ef   : > { %v728_v31 = vsub.f32 %v711_v22, %v724_v30 }
 0x1f1   : > { %v730_v32 = vmul.f32 1.442695, %v728_v31 }
 0x1f2   : > { %v727_v33 = vpop.xlane.xlu0 %726 }
 0x1f3   : > { %1586 = vpow2.f32 %v730_v32  ;;  %v729_v34 = vsub.f32 %v1463_v21, %v727_v33 }
 0x1f5   : > { %v732_v35 = vmul.f32 1.442695, %v729_v34 }
 0x1f7   : > { %1588 = vpow2.f32 %v732_v35 }
 0x1fd   : > { %v1587_v36 = vpop.eup %1586 }
 0x1fe   : > { %v734_v37 = vsel %vm721_vm1, %v1587_v36, 0.0  ;;  %v741_v38 = vsel %vm721_vm1, %v1587_v36, 0 }
 0x1ff   : > { %735 = vadd.xlane.f32.xlu1 %v734_v37  ;;  %v812_v39 = vand.u32 4294901760, %v741_v38 }
 0x201   : > { %v1589_v40 = vpop.eup %1588  ;;  %v813_v41 = vsub.f32 %v741_v38, %v812_v39 }
 0x202   : > { %v737_v42 = vsel %vm721_vm1, %v1589_v40, 0.0  ;;  %v744_v43 = vsel %vm721_vm1, %v1589_v40, 0 }
 0x203   : > { %738 = vadd.xlane.f32.xlu1 %v737_v42  ;;  %v814_v44 = vand.u32 4294901760, %v813_v41  ;;  %v822_v45 = vand.u32 4294901760, %v744_v43 }
 0x205   : > { %v815_v46 = vsub.f32 %v813_v41, %v814_v44  ;;  %v823_v47 = vsub.f32 %v744_v43, %v822_v45 }
 0x207   : > { %v816_v48 = vand.u32 4294901760, %v815_v46  ;;  %v824_v49 = vand.u32 4294901760, %v823_v47 }
 0x209   : > { %1466 = vmatprep.mubr.f32.mxu1 %v816_v48  ;;  %v825_v50 = vsub.f32 %v823_v47, %v824_v49 }
 0x20b   : > { %v826_v51 = vand.u32 4294901760, %v825_v50 }
 0x20d   : > { %1467 = vmatmul.mubr.f32.vlgmr.msra.gmra.mrb[0].mxu1 %v826_v51 }
 0x20e   : > { %1470 = vmatpush3.msra.mxu1 %v837_v29  ;;  %1471 = vmatprep.mubr.f32.mxu1 %v812_v39 }
 0x20f   : > { %1474 = vmatprep.subr.mxu1 %v834_v26 }
 0x215   : > { %1472 = vmatmul.mubr.f32.vlgmr.msra.gmra.mrb[0].mxu1 %v822_v45 }
 0x216   : > { %1475 = vmatpush3.msra.mxu1 %v834_v26  ;;  %1476 = vmatprep.mubr.f32.mxu1 %v813_v41 }
 0x217   : > { %1479 = vmatprep.subr.mxu1 %v747_v25 }
 0x21d   : > { %1477 = vmatmul.mubr.f32.vlgmr.msra.gmra.mrb[0].mxu1 %v823_v47 }
 0x21e   : > { %1480 = vmatpush3.msra.mxu1 %v747_v25  ;;  %1481 = vmatprep.mubr.f32.mxu1 %v814_v44 }
 0x21f   : > { %1484 = vmatprep.subr.mxu1 %v835_v27 }
 0x225   : > { %1482 = vmatmul.mubr.f32.vlgmr.msra.gmra.mrb[0].mxu1 %v824_v49 }
 0x226   : > { %1485 = vmatpush3.msra.mxu1 %v835_v27  ;;  %1486 = vmatprep.mubr.f32.mxu1 %v812_v39 }
 0x227   : > { %1489 = vmatprep.subr.mxu1 %v747_v25 }
 0x22d   : > { %1487 = vmatmul.mubr.f32.vlgmr.msra.gmra.mrb[0].mxu1 %v822_v45 }
 0x22e   : > { %1490 = vmatpush3.msra.mxu1 %v747_v25  ;;  %1491 = vmatprep.mubr.f32.mxu1 %v812_v39 }
 0x235   : > { %1492 = vmatmul.mubr.f32.vlgmr.msra.gmra.mrb[0].mxu1 %v822_v45 }
 0x28c   : > { %v736_v52 = vpop.xlane.xlu1 %735 }
 0x290   : > { %v739_v53 = vpop.xlane.xlu1 %738 }
 0x291   : > { %1590 = vrcp.f32 %v739_v53 }
 0x292   : > { %1592 = vrcp.f32 %v736_v52 }
 0x29b   : > { %v1591_v54 = vpop.eup %1590 }
 0x29c   : > { %v1593_v56 = vpop.eup %1592 }
 0x308   : > { %v1493_v55 = vpop.f32.mrb[0].mxu1 }
 0x309   : > { %v1238_v57 = vmul.f32 %v1591_v54, %v1493_v55  ;;  %v1225_v58 = vpop.f32.mrb[1].mxu1 }
 0x30a   : > { %v1236_v59 = vmul.f32 %v1593_v56, %v1225_v58 }
 0x30b   : > { %1243 = vrot.lane.b32.xlu1 %v1238_v57, %s1746_s21 }
 0x30c   : > { %1241 = vrot.lane.b32.xlu0 %v1236_v59, %s1746_s21 }
 0x37d   : > { %v1244_v60 = vpop.permute.xlu1 %1243 }
 0x37e   : > { %v1248_v61 = vsel %vm222_vm0, %v1939_v2, %v1244_v60  ;;  %v1242_v62 = vpop.permute.xlu0 %1241 }
 0x37f   : > { %1251 = vst.msk [vmem:[%s216_s16 + $0x8] sm:$0xff] %vm1249_vm2, %v1248_v61  ;;  %v1247_v63 = vsel %vm222_vm0, %v1937_v1, %v1242_v62 }
 0x380   : > { %1250 = vst.msk [vmem:[%s216_s16] sm:$0xff] %vm1249_vm2, %v1247_v63 }
 0x381   : > { %1667 = shalt.err (!%p1664_p2)
}
 0x382   : > { %s1668_s20 = scalar_lea.hbm %s1960_s7, 256  ;;  %s1672_s25 = scalar_lea.hbm %s2015_s2, 512 }
 0x383   : > { %p1669_p9 = scmp.ne.s32.totalorder %s1960_s7, %s1668_s20  ;;  %p1673_p6 = scmp.lt.u32.totalorder %s1960_s7, %s2015_s2 }
 0x384   : > { %p1674_p4 = scmp.lt.u32.totalorder %s1672_s25, %s1668_s20  ;;  %p1676_p0 = scmp.lt.u32.totalorder %s1668_s20, %s1960_s7 }
 0x385   : > { %p1670_p11 = pnand %p1669_p9, %p2027_p5 }
 0x386   : > { %p1675_p8 = por %p1674_p4, %p1673_p6 }
 0x387   : > { %p1671_p3 = pneg %p1670_p11 }
 0x388   : > { %p1677_p7 = por %p1676_p0, %p1675_p8 }
 0x38a   : > { %p1678_p13 = pnand %p1677_p7, %p1671_p3 }
 0x38c   : > { %1681 = shalt.err (!%p1678_p13)
}
 0x38d   : > { %s1748_s21 = smov 128   ;;  %s1749_s16 = smov 8  }
 0x38e   : > { %1518 = dma.vmem_to_hbm [thread:$0]  (%p2027_p5), %s1955_s19, 256, %s1960_s7, %s1253_s12, %s1748_s21, %s1748_s21, %s1749_s16  }
 0x38f PF: > { %s1283_s30 = sand.u32 1, %s1720_s9   ;;  %p2028_p10 = scmp.ne.s32.totalorder %s2021_s24, 0 }
 0x390   : > { %p2029_p12 = scmp.ge.s32.totalorder %s1740_s14, 2  ;;  %s1284_s28 = scalar_lea.sflag [#allocation4], %s1283_s30 }
 0x392   : > { %p1528_p1 = pnand %p2029_p12, %p2028_p10 }
 0x394   : > { %1715 = dma.done.wait (!%p1528_p1), %s1284_s28, 256  }
 0x395   : > { %1717 = vsyncadd (!%p1528_p1), %s1284_s28, 4294967040  ;;  %s21_s14 = sadd.s32 1, %s1740_s14   ;;  %s2030_s9 = smov %s1724_s10 }
 0x396   : > { %p18_p2 = scmp.ge.s32.totalorder %s21_s14, 4   ;;  %s2031_s10 = smov %s1728_s11 }
 0x397   : > { %s2032_s11 = smov %s1821_s23  ;;  %s2033_s12 = smov %s1736_s13 }
 0x398   : > { %s2034_s13 = smov %s2036_s17  ;;  %20 = sbr.rel (!%p18_p2) target bundleno = 8 (0x8), region = 86 }
 0x39f   :  { %1289 = vsyncpa [#allocation3], 1 }
 0x3a0   :  { %1291 = vsyncpa [#allocation3 + $0x1], 1 }
 0x3a1   :  { %1292 = vsyncpa [#allocation6], 1 }
 0x3a2   :  { %1294 = vsyncpa [#allocation6 + $0x1], 1 }
 0x3a3   :  { %1295 = vsyncpa [#allocation4], 1 }
 0x3a4   :  { %1297 = vsyncpa [#allocation4 + $0x1], 1 }

</bundles_post_ra>
